<compile_context>
chip_gen: v5e
topology: v5e:2x2
jax: 0.10.0
libtpu: 0.0.40
codegen_flags: <defaults>
</compile_context>

<pallas_src>
import jax
import jax.numpy as jnp
from jax.experimental import pallas as pl
from jax.experimental.pallas import tpu as pltpu

LANE = 128
SUBLANE = 8


def _round_up(n, m):
    return ((n + m - 1) // m) * m


def mlp_kernel(x_ref, w1_ref, b1_ref, w2_ref, b2_ref, w3_ref, b3_ref, o_ref):
    # Layer 1: Linear + ReLU (MXU matmul, f32 accumulation; K is zero-padded)
    h1 = jnp.dot(x_ref[...], w1_ref[...], preferred_element_type=jnp.float32)
    h1 = jnp.maximum(h1 + b1_ref[...], 0.0)
    # Layer 2: Linear + ReLU
    h2 = jnp.dot(h1, w2_ref[...], preferred_element_type=jnp.float32)
    h2 = jnp.maximum(h2 + b2_ref[...], 0.0)
    # Layer 3: Linear (logits / Q-values, no activation). Output is lane-dense
    # (padded to 128 columns) so the store is an unmasked full-lane vst.
    out = jnp.dot(h2, w3_ref[...], preferred_element_type=jnp.float32)
    o_ref[...] = (out + b3_ref[...]).astype(o_ref.dtype)


def mlp_forward(x, params, tile_b=512):
    """x: [B, input_dim] float32. params: dict of w1,b1,w2,b2,w3,b3 (unpadded)."""
    w1, b1 = params["w1"], params["b1"]
    w2, b2 = params["w2"], params["b2"]
    w3, b3 = params["w3"], params["b3"]

    B, in_dim = x.shape
    hidden = w1.shape[1]
    out_dim = w3.shape[1]

    # --- pad feature dims to hardware-friendly sizes -------------------------
    in_pad = _round_up(in_dim, SUBLANE)    # e.g. 4 -> 8
    out_pad = _round_up(out_dim, LANE)     # e.g. 2 -> 128 (lane-dense store)

    x_p = x if in_pad == in_dim else jnp.pad(x, ((0, 0), (0, in_pad - in_dim)))
    w1_p = w1 if in_pad == in_dim else jnp.pad(w1, ((0, in_pad - in_dim), (0, 0)))
    w3_p = w3 if out_pad == out_dim else jnp.pad(w3, ((0, 0), (0, out_pad - out_dim)))
    b3_p = b3 if out_pad == out_dim else jnp.pad(b3, ((0, 0), (0, out_pad - out_dim)))

    # --- tile the batch dimension --------------------------------------------
    # Big tiles amortize the ~0.35 us per-grid-step overhead; clamp to the
    # (sublane-rounded) batch so tiny batches still produce a valid block.
    tile_b = max(SUBLANE, min(int(tile_b), _round_up(B, SUBLANE)))
    B_pad = _round_up(B, tile_b)
    if B_pad != B:
        x_p = jnp.pad(x_p, ((0, B_pad - B), (0, 0)))

    grid = (B_pad // tile_b,)

    # x / out move per grid step; weights & biases are resident (constant map).
    x_spec = pl.BlockSpec((tile_b, in_pad), lambda i: (i, 0))
    w1_spec = pl.BlockSpec((in_pad, hidden), lambda i: (0, 0))
    b1_spec = pl.BlockSpec((1, hidden), lambda i: (0, 0))
    w2_spec = pl.BlockSpec((hidden, hidden), lambda i: (0, 0))
    b2_spec = pl.BlockSpec((1, hidden), lambda i: (0, 0))
    w3_spec = pl.BlockSpec((hidden, out_pad), lambda i: (0, 0))
    b3_spec = pl.BlockSpec((1, out_pad), lambda i: (0, 0))
    out_spec = pl.BlockSpec((tile_b, out_pad), lambda i: (i, 0))

    out_padded = pl.pallas_call(
        mlp_kernel,
        out_shape=jax.ShapeDtypeStruct((B_pad, out_pad), x.dtype),
        grid=grid,
        in_specs=[x_spec, w1_spec, b1_spec, w2_spec, b2_spec, w3_spec, b3_spec],
        out_specs=out_spec,
        compiler_params=pltpu.CompilerParams(
            dimension_semantics=("parallel",),  # v7x: shard batch tiles over 2 TCs
        ),
    )(x_p, w1_p, b1, w2, b2, w3_p, b3_p)

    # Slice back to the true batch / output width.
    return out_padded[:B, :out_dim]


def init_params(key, input_dim, output_dim, hidden=128):
    """Deterministic init mirroring nn.Linear's default U(-1/sqrt(fan_in), +)."""
    ks = jax.random.split(key, 6)

    def linear(kw, kb, fan_in, fan_out):
        bound = 1.0 / jnp.sqrt(fan_in)
        w = jax.random.uniform(kw, (fan_in, fan_out), jnp.float32, -bound, bound)
        b = jax.random.uniform(kb, (1, fan_out), jnp.float32, -bound, bound)
        return w, b

    w1, b1 = linear(ks[0], ks[1], input_dim, hidden)
    w2, b2 = linear(ks[2], ks[3], hidden, hidden)
    w3, b3 = linear(ks[4], ks[5], hidden, output_dim)
    return {"w1": w1, "b1": b1, "w2": w2, "b2": b2, "w3": w3, "b3": b3}


def _reference(x, params):
    h = jnp.maximum(x @ params["w1"] + params["b1"], 0.0)
    h = jnp.maximum(h @ params["w2"] + params["b2"], 0.0)
    return h @ params["w3"] + params["b3"]


if __name__ == "__main__":
    # CartPole-v1: observation dim = 4, action dim = 2
    input_dim, output_dim = 4, 2

    key = jax.random.PRNGKey(0)
    kx, kx2, kp = jax.random.split(key, 3)
    params = init_params(kp, input_dim, output_dim)

    # Small-batch check (typical single-env RL rollout shape).
    batch = 8
    x = jax.random.normal(kx, (batch, input_dim), dtype=jnp.float32)
    out = mlp_forward(x, params)
    jax.block_until_ready(out)
    ref = _reference(x, params)
    assert out.shape == (batch, output_dim)
    assert jnp.allclose(out, ref, atol=1e-5, rtol=1e-5)

    # Multi-tile check: exercises the batch grid (grid=2 steps) + batch padding.
    batch2 = 200  # not a multiple of tile_b -> exercises zero-pad + slice path
    x2 = jax.random.normal(kx2, (batch2, input_dim), dtype=jnp.float32)
    out2 = mlp_forward(x2, params, tile_b=128)
    jax.block_until_ready(out2)
    ref2 = _reference(x2, params)
    assert out2.shape == (batch2, output_dim)
    assert jnp.allclose(out2, ref2, atol=1e-5, rtol=1e-5)

    print("KERNEL_OK")
</pallas_src>

<mosaic_0001>
module attributes {stable_mosaic.version = 11 : i64} {
  func.func @mlp_kernel(%arg0: i32, %arg1: memref<8x8xf32, #tpu.memory_space<vmem>>, %arg2: memref<8x128xf32, #tpu.memory_space<vmem>>, %arg3: memref<1x128xf32, #tpu.memory_space<vmem>>, %arg4: memref<128x128xf32, #tpu.memory_space<vmem>>, %arg5: memref<1x128xf32, #tpu.memory_space<vmem>>, %arg6: memref<128x128xf32, #tpu.memory_space<vmem>>, %arg7: memref<1x128xf32, #tpu.memory_space<vmem>>, %arg8: memref<8x128xf32, #tpu.memory_space<vmem>>) attributes {dimension_semantics = [#tpu.dimension_semantics<parallel>], iteration_bounds = array<i64: 1>, scalar_prefetch = 0 : i64, scratch_operands = 0 : i64, tpu.core_type = #tpu.core_type<tc>, window_params = [{transform_indices = @transform_0, window_bounds = array<i64: 8, 8>}, {pipeline_mode = #tpu.pipeline_mode<synchronous>, transform_indices = @transform_1, window_bounds = array<i64: 8, 128>}, {pipeline_mode = #tpu.pipeline_mode<synchronous>, transform_indices = @transform_2, window_bounds = array<i64: 1, 128>}, {pipeline_mode = #tpu.pipeline_mode<synchronous>, transform_indices = @transform_3, window_bounds = array<i64: 128, 128>}, {pipeline_mode = #tpu.pipeline_mode<synchronous>, transform_indices = @transform_4, window_bounds = array<i64: 1, 128>}, {pipeline_mode = #tpu.pipeline_mode<synchronous>, transform_indices = @transform_5, window_bounds = array<i64: 128, 128>}, {pipeline_mode = #tpu.pipeline_mode<synchronous>, transform_indices = @transform_6, window_bounds = array<i64: 1, 128>}, {transform_indices = @transform_7, window_bounds = array<i64: 8, 128>}]} {
    %c0 = arith.constant 0 : index
    %c0_0 = arith.constant 0 : index
    %0 = vector.load %arg1[%c0, %c0_0] : memref<8x8xf32, #tpu.memory_space<vmem>>, vector<8x8xf32>
    %c0_1 = arith.constant 0 : index
    %c0_2 = arith.constant 0 : index
    %1 = vector.load %arg2[%c0_1, %c0_2] : memref<8x128xf32, #tpu.memory_space<vmem>>, vector<8x128xf32>
    %cst = arith.constant dense<0.000000e+00> : vector<8x128xf32>
    %2 = tpu.matmul %0, %1, %cst {dimension_numbers = #tpu.dot_dimension_numbers<[1], [0], [0], [1], [0, 0, 1, 1], [], []>} : vector<8x8xf32>, vector<8x128xf32>, vector<8x128xf32> -> vector<8x128xf32>
    %c0_3 = arith.constant 0 : index
    %c0_4 = arith.constant 0 : index
    %3 = vector.load %arg3[%c0_3, %c0_4] : memref<1x128xf32, #tpu.memory_space<vmem>>, vector<1x128xf32>
    %4 = vector.broadcast %3 : vector<1x128xf32> to vector<8x128xf32>
    %5 = arith.addf %2, %4 : vector<8x128xf32>
    %cst_5 = arith.constant 0.000000e+00 : f32
    %6 = vector.broadcast %cst_5 : f32 to vector<8x128xf32>
    %7 = arith.maximumf %5, %6 : vector<8x128xf32>
    %c0_6 = arith.constant 0 : index
    %c0_7 = arith.constant 0 : index
    %8 = vector.load %arg4[%c0_6, %c0_7] : memref<128x128xf32, #tpu.memory_space<vmem>>, vector<128x128xf32>
    %cst_8 = arith.constant dense<0.000000e+00> : vector<8x128xf32>
    %9 = tpu.matmul %7, %8, %cst_8 {dimension_numbers = #tpu.dot_dimension_numbers<[1], [0], [0], [1], [0, 0, 1, 1], [], []>} : vector<8x128xf32>, vector<128x128xf32>, vector<8x128xf32> -> vector<8x128xf32>
    %c0_9 = arith.constant 0 : index
    %c0_10 = arith.constant 0 : index
    %10 = vector.load %arg5[%c0_9, %c0_10] : memref<1x128xf32, #tpu.memory_space<vmem>>, vector<1x128xf32>
    %11 = vector.broadcast %10 : vector<1x128xf32> to vector<8x128xf32>
    %12 = arith.addf %9, %11 : vector<8x128xf32>
    %cst_11 = arith.constant 0.000000e+00 : f32
    %13 = vector.broadcast %cst_11 : f32 to vector<8x128xf32>
    %14 = arith.maximumf %12, %13 : vector<8x128xf32>
    %c0_12 = arith.constant 0 : index
    %c0_13 = arith.constant 0 : index
    %15 = vector.load %arg6[%c0_12, %c0_13] : memref<128x128xf32, #tpu.memory_space<vmem>>, vector<128x128xf32>
    %cst_14 = arith.constant dense<0.000000e+00> : vector<8x128xf32>
    %16 = tpu.matmul %14, %15, %cst_14 {dimension_numbers = #tpu.dot_dimension_numbers<[1], [0], [0], [1], [0, 0, 1, 1], [], []>} : vector<8x128xf32>, vector<128x128xf32>, vector<8x128xf32> -> vector<8x128xf32>
    %c0_15 = arith.constant 0 : index
    %c0_16 = arith.constant 0 : index
    %17 = vector.load %arg7[%c0_15, %c0_16] : memref<1x128xf32, #tpu.memory_space<vmem>>, vector<1x128xf32>
    %18 = vector.broadcast %17 : vector<1x128xf32> to vector<8x128xf32>
    %19 = arith.addf %16, %18 : vector<8x128xf32>
    %c0_17 = arith.constant 0 : index
    %c0_18 = arith.constant 0 : index
    %20 = vector.load %arg8[%c0_17, %c0_18] : memref<8x128xf32, #tpu.memory_space<vmem>>, vector<8x128xf32>
    tpu.vector_store %arg8[%c0_17, %c0_18], %19 {strides = array<i32>} : memref<8x128xf32, #tpu.memory_space<vmem>>, vector<8x128xf32>,
    return
  }
  func.func @transform_0(%arg0: i32) -> (i32, i32) {
    %c0_i32 = arith.constant 0 : i32
    %c0_i32_0 = arith.constant 0 : i32
    return %arg0, %c0_i32 : i32, i32
  }
  func.func @transform_1(%arg0: i32) -> (i32, i32) {
    %c0_i32 = arith.constant 0 : i32
    %c0_i32_0 = arith.constant 0 : i32
    %c0_i32_1 = arith.constant 0 : i32
    return %c0_i32, %c0_i32_0 : i32, i32
  }
  func.func @transform_2(%arg0: i32) -> (i32, i32) {
    %c0_i32 = arith.constant 0 : i32
    %c0_i32_0 = arith.constant 0 : i32
    %c0_i32_1 = arith.constant 0 : i32
    return %c0_i32, %c0_i32_0 : i32, i32
  }
  func.func @transform_3(%arg0: i32) -> (i32, i32) {
    %c0_i32 = arith.constant 0 : i32
    %c0_i32_0 = arith.constant 0 : i32
    %c0_i32_1 = arith.constant 0 : i32
    return %c0_i32, %c0_i32_0 : i32, i32
  }
  func.func @transform_4(%arg0: i32) -> (i32, i32) {
    %c0_i32 = arith.constant 0 : i32
    %c0_i32_0 = arith.constant 0 : i32
    %c0_i32_1 = arith.constant 0 : i32
    return %c0_i32, %c0_i32_0 : i32, i32
  }
  func.func @transform_5(%arg0: i32) -> (i32, i32) {
    %c0_i32 = arith.constant 0 : i32
    %c0_i32_0 = arith.constant 0 : i32
    %c0_i32_1 = arith.constant 0 : i32
    return %c0_i32, %c0_i32_0 : i32, i32
  }
  func.func @transform_6(%arg0: i32) -> (i32, i32) {
    %c0_i32 = arith.constant 0 : i32
    %c0_i32_0 = arith.constant 0 : i32
    %c0_i32_1 = arith.constant 0 : i32
    return %c0_i32, %c0_i32_0 : i32, i32
  }
  func.func @transform_7(%arg0: i32) -> (i32, i32) {
    %c0_i32 = arith.constant 0 : i32
    %c0_i32_0 = arith.constant 0 : i32
    return %arg0, %c0_i32 : i32, i32
  }
}

</mosaic_0001>

<bundles_post_ra>
// kernel: tpu_custom_call.1
= control target key start
LH: loop header
LB: loop body
LE: loop exit
PB: predicated region body
PF: predicated region fallthrough
CT: control target
= control target key end

     0   :  { %12 = vsyncpa [#allocation3], 0  ;;  %s428_s0 = inlined_call_operand.hbm [shape: f32[8,8], index: 0, kind: input, shape index: {}]   ;;  %s429_s1 = inlined_call_operand.hbm [shape: f32[8,128], index: 1, kind: input, shape index: {}]   ;;  %s430_s2 = inlined_call_operand.vmem [shape: f32[1,128], index: 2, kind: input, shape index: {}]   ;;  %s431_s3 = inlined_call_operand.hbm [shape: f32[128,128], index: 3, kind: input, shape index: {}]   ;;  %s432_s4 = inlined_call_operand.vmem [shape: f32[1,128], index: 4, kind: input, shape index: {}]   ;;  %s433_s5 = inlined_call_operand.hbm [shape: f32[128,128], index: 5, kind: input, shape index: {}]   ;;  %s434_s6 = inlined_call_operand.vmem [shape: f32[1,128], index: 6, kind: input, shape index: {}]   ;;  %s435_s7 = inlined_call_operand.hbm [shape: f32[8,128], index: 7, kind: output, shape index: {}]  }
   0x1   :  { %13 = vsyncpa [#allocation6], 0 }
   0x2   :  { %14 = vsyncpa [#allocation9], 0  ;;  %s32_s26 = sshll.u32 %s429_s1, 4  ;;  %s33_s26 = int_to_ptr.hbm [resolvable:$true] %s32_s26 }
   0x3   :  { %15 = vsyncpa [#allocation4], 0  ;;  %s357_s27 = smov [#allocation5]   ;;  %s21_s8 = sshll.u32 %s428_s0, 4  ;;  %s22_s8 = int_to_ptr.hbm [resolvable:$true] %s21_s8 }
   0x4   :  { %s34_s28 = sshll.u32 %s357_s27, 4  ;;  %s358_s9 = smov [#allocation2]   ;;  %s35_s28 = int_to_ptr.vmem [resolvable:$true] %s34_s28 }
   0x5   :  { %37 = dma.hbm_to_vmem [thread:$0]  %s33_s26, 128, %s35_s28, [#allocation6]  }
   0x6   :  { %s23_s10 = sshll.u32 %s358_s9, 4  ;;  %s44_s13 = sshll.u32 %s431_s3, 4  ;;  %s24_s10 = int_to_ptr.vmem [resolvable:$true] %s23_s10  ;;  %s45_s13 = int_to_ptr.hbm [resolvable:$true] %s44_s13 }
   0x7   :  { %26 = dma.hbm_to_vmem [thread:$0]  %s22_s8, 128, %s24_s10, [#allocation3]  }
   0x8   :  { %s359_s1 = smov [#allocation7]   ;;  %s59_s17 = sshll.u32 %s433_s5, 4  ;;  %s60_s17 = int_to_ptr.hbm [resolvable:$true] %s59_s17 }
   0x9   :  { %s46_s14 = sshll.u32 %s359_s1, 4  ;;  %s360_s18 = smov 128   ;;  %s47_s14 = int_to_ptr.vmem [resolvable:$true] %s46_s14 }
   0xa   :  { %s361_s0 = smov 8   ;;  %s362_s19 = smov [#allocation8]  }
   0xb   :  { %52 = dma.hbm_to_vmem [thread:$0]  %s45_s13, 2048, %s47_s14, [#allocation6], %s360_s18, %s360_s18, %s361_s0  }
   0xc   :  { %s61_s20 = sshll.u32 %s362_s19, 4  ;;  %s62_s20 = int_to_ptr.vmem [resolvable:$true] %s61_s20 }
   0xd   :  { %67 = dma.hbm_to_vmem [thread:$0]  %s60_s17, 2048, %s62_s20, [#allocation9], %s360_s18, %s360_s18, %s361_s0  }
   0xe   :  { %349 = dma.done.wait [#allocation3], 128  }
   0xf   :  { %350 = vsyncadd [#allocation3], 4294967168 }
  0x10   :  { %351 = dma.done.wait [#allocation6], 2176  }
  0x11   :  { %352 = vsyncadd [#allocation6], 4294965120 }
  0x12   :  { %353 = dma.done.wait [#allocation9], 2048  }
  0x13   :  { %354 = vsyncadd [#allocation9], 4294965248  ;;  %vm92_vm0 = vcmask 64512   ;;  %v87_v0 = vld [vmem:[#allocation5] sm:$0xff]  ;;  %v86_v1 = vld [vmem:[#allocation2] sm:$0xff]  ;;  %s363_s24 = smov [#allocation10]  }
  0x14   :  { %v132_v2 = vld [vmem:[#allocation7 + $0x78] sm:$0xff]  ;;  %111 = vmatpush.msra.mxu0 %v87_v0  ;;  %v131_v3 = vld [vmem:[#allocation7 + $0x70] sm:$0xff]  ;;  %v130_v4 = vld [vmem:[#allocation7 + $0x68] sm:$0xff]  ;;  %s204_s25 = sshll.u32 %s363_s24, 4  ;;  %s206_s28 = sshll.u32 %s435_s7, 4  ;;  %s205_s25 = int_to_ptr.vmem [resolvable:$true] %s204_s25  ;;  %s207_s28 = int_to_ptr.hbm [resolvable:$true] %s206_s28 }
  0x15   :  { %137 = vmatpush.msra.mxu1 %v132_v2  ;;  %218 = vmatmul.msk.f32.vlgmr.msra.gmra.mxu0 %vm92_vm0, %v86_v1  ;;  %v129_v5 = vld [vmem:[#allocation7 + $0x60] sm:$0xff]  ;;  %v128_v6 = vld [vmem:[#allocation7 + $0x58] sm:$0xff]  ;;  %v127_v7 = vld [vmem:[#allocation7 + $0x50] sm:$0xff] }
  0x16   :  { %v126_v8 = vld [vmem:[#allocation7 + $0x48] sm:$0xff]  ;;  %v125_v9 = vld [vmem:[#allocation7 + $0x40] sm:$0xff]  ;;  %v124_v10 = vld [vmem:[#allocation7 + $0x38] sm:$0xff] }
  0x17   :  { %138 = vmatpush.msra.mxu1 %v131_v3  ;;  %v123_v11 = vld [vmem:[#allocation7 + $0x30] sm:$0xff]  ;;  %v122_v12 = vld [vmem:[#allocation7 + $0x28] sm:$0xff]  ;;  %v121_v13 = vld [vmem:[#allocation7 + $0x20] sm:$0xff] }
  0x18   :  { %v120_v14 = vld [vmem:[#allocation7 + $0x18] sm:$0xff]  ;;  %v119_v15 = vld [vmem:[#allocation7 + $0x10] sm:$0xff]  ;;  %v118_v16 = vld [vmem:[#allocation7 + $0x8] sm:$0xff] }
  0x19   :  { %139 = vmatpush.msra.mxu1 %v130_v4  ;;  %v117_v17 = vld [vmem:[#allocation7] sm:$0xff]  ;;  %v173_v18 = vld [vmem:[#allocation8 + $0x78] sm:$0xff]  ;;  %v172_v19 = vld [vmem:[#allocation8 + $0x70] sm:$0xff] }
  0x1a   :  { %178 = vmatpush.msra.mxu2 %v173_v18  ;;  %v171_v20 = vld [vmem:[#allocation8 + $0x68] sm:$0xff]  ;;  %v170_v21 = vld [vmem:[#allocation8 + $0x60] sm:$0xff]  ;;  %v169_v22 = vld [vmem:[#allocation8 + $0x58] sm:$0xff] }
  0x1b   :  { %140 = vmatpush.msra.mxu1 %v129_v5  ;;  %v168_v23 = vld [vmem:[#allocation8 + $0x50] sm:$0xff]  ;;  %v167_v24 = vld [vmem:[#allocation8 + $0x48] sm:$0xff]  ;;  %v166_v25 = vld [vmem:[#allocation8 + $0x40] sm:$0xff] }
  0x1c   :  { %179 = vmatpush.msra.mxu2 %v172_v19  ;;  %v165_v26 = vld [vmem:[#allocation8 + $0x38] sm:$0xff]  ;;  %v164_v27 = vld [vmem:[#allocation8 + $0x30] sm:$0xff]  ;;  %v163_v28 = vld [vmem:[#allocation8 + $0x28] sm:$0xff] }
  0x1d   :  { %141 = vmatpush.msra.mxu1 %v128_v6  ;;  %v162_v29 = vld [vmem:[#allocation8 + $0x20] sm:$0xff]  ;;  %v161_v30 = vld [vmem:[#allocation8 + $0x18] sm:$0xff]  ;;  %v226_v31 = vld [vmem:[%s430_s2] ss:$0 sm:$0xff] }
  0x1e   :  { %180 = vmatpush.msra.mxu2 %v171_v20  ;;  %v160_v35 = vld [vmem:[#allocation8 + $0x10] sm:$0xff]  ;;  %v159_v36 = vld [vmem:[#allocation8 + $0x8] sm:$0xff]  ;;  %v158_v37 = vld [vmem:[#allocation8] sm:$0xff] }
  0x1f   :  { %142 = vmatpush.msra.mxu1 %v127_v7  ;;  %v227_v38 = vld [vmem:[%s432_s4] ss:$0 sm:$0xff] }
  0x20   :  { %181 = vmatpush.msra.mxu2 %v170_v21  ;;  %v228_v42 = vld [vmem:[%s434_s6] ss:$0 sm:$0xff] }
  0x21   :  { %143 = vmatpush.msra.mxu1 %v126_v8 }
  0x22   :  { %182 = vmatpush.msra.mxu2 %v169_v22 }
  0x23   :  { %144 = vmatpush.msra.mxu1 %v125_v9 }
  0x24   :  { %183 = vmatpush.msra.mxu2 %v168_v23 }
  0x25   :  { %145 = vmatpush.msra.mxu1 %v124_v10 }
  0x26   :  { %184 = vmatpush.msra.mxu2 %v167_v24 }
  0x27   :  { %146 = vmatpush.msra.mxu1 %v123_v11 }
  0x28   :  { %185 = vmatpush.msra.mxu2 %v166_v25 }
  0x29   :  { %147 = vmatpush.msra.mxu1 %v122_v12 }
  0x2a   :  { %186 = vmatpush.msra.mxu2 %v165_v26 }
  0x2b   :  { %148 = vmatpush.msra.mxu1 %v121_v13 }
  0x2c   :  { %187 = vmatpush.msra.mxu2 %v164_v27 }
  0x2d   :  { %149 = vmatpush.msra.mxu1 %v120_v14 }
  0x2e   :  { %188 = vmatpush.msra.mxu2 %v163_v28 }
  0x2f   :  { %150 = vmatpush.msra.mxu1 %v119_v15 }
  0x30   :  { %189 = vmatpush.msra.mxu2 %v162_v29 }
  0x31   :  { %151 = vmatpush.msra.mxu1 %v118_v16 }
  0x32   :  { %190 = vmatpush.msra.mxu2 %v161_v30 }
  0x33   :  { %152 = vmatpush.msra.mxu1 %v117_v17 }
  0x34   :  { %191 = vmatpush.msra.mxu2 %v160_v35 }
  0x36   :  { %192 = vmatpush.msra.mxu2 %v159_v36 }
  0x38   :  { %193 = vmatpush.msra.mxu2 %v158_v37 }
  0x92   :  { %v113_v32 = vpop.f32.mrf.mxu0 }
  0x93   :  { %v114_v33 = vadd.f32 %v226_v31, %v113_v32 }
  0x95   :  { %v116_v34 = vmax.f32 %v114_v33, 0.0 }
  0x97   :  { %153 = vmatmul.f32.vlgmr.msra.gmra.mxu1 %v116_v34 }
 0x114   :  { %v154_v39 = vpop.f32.mrf.mxu1 }
 0x115   :  { %v155_v40 = vadd.f32 %v227_v38, %v154_v39 }
 0x117   :  { %v157_v41 = vmax.f32 %v155_v40, 0.0 }
 0x119   :  { %194 = vmatmul.f32.vlgmr.msra.gmra.mxu2 %v157_v41 }
 0x19c   :  { %v195_v43 = vpop.f32.mrf.mxu2 }
 0x19d   :  { %v196_v44 = vadd.f32 %v228_v42, %v195_v43 }
 0x19f   :  { %198 = vst [vmem:[#allocation10] sm:$0xff] %v196_v44 }
 0x1a0   :  { %209 = dma.vmem_to_hbm [thread:$0]  %s205_s25, 128, %s207_s28, [#allocation4]  }
 0x1a1   :  { %355 = dma.done.wait [#allocation4], 128  }
 0x1a2   :  { %356 = vsyncadd [#allocation4], 4294967168 }
 0x1a3   :  { %214 = vsyncpa [#allocation3], 1 }
 0x1a4   :  { %215 = vsyncpa [#allocation6], 1 }
 0x1a5   :  { %216 = vsyncpa [#allocation9], 1 }
 0x1a6   :  { %217 = vsyncpa [#allocation4], 1 }

</bundles_post_ra>
